<compile_context>
chip_gen: v7x
topology: tpu7x:2x2x1
jax: 0.10.0
libtpu: 0.0.40
codegen_flags: <defaults>
</compile_context>

<pallas_src>
import functools

import jax
import jax.numpy as jnp
from jax.experimental import pallas as pl
from jax.experimental.pallas import tpu as pltpu


def _round_up(x, m):
    return ((x + m - 1) // m) * m


def _make_kernel(n_pose_emb, n_betas, n_hands):
    # static lane-segment boundaries inside the flat-prior slab
    o_pe = n_pose_emb                 # end of pose_embedding
    o_sh = o_pe + n_betas             # end of betas
    o_hd = o_sh + n_hands             # end of both hand poses
    o_ang = o_hd + 4                  # end of angle-prior args

    def kernel(w_ref, cam_ref, pts_ref, gtw_ref, flat_ref, out_ref):
        # ---- SMEM scalars first (precomputed squares on host) ----
        dw2 = w_ref[0]       # data_weight^2
        dw = w_ref[1]        # data_weight
        bw2 = w_ref[2]       # body_pose_weight^2
        sw2 = w_ref[3]       # shape_weight^2
        bend_w = w_ref[4]    # bending_prior_weight
        hw2 = w_ref[5]       # hand_prior_weight^2
        rho2 = w_ref[6]      # rho^2

        r00 = cam_ref[0]; r01 = cam_ref[1]; r02 = cam_ref[2]
        r10 = cam_ref[3]; r11 = cam_ref[4]; r12 = cam_ref[5]
        r20 = cam_ref[6]; r21 = cam_ref[7]; r22 = cam_ref[8]
        tx = cam_ref[9]; ty = cam_ref[10]; tz = cam_ref[11]
        fx = cam_ref[12]; fy = cam_ref[13]; cx = cam_ref[14]; cy = cam_ref[15]

        # ---- single perspective projection pass over joints+vertices lanes ----
        x = pts_ref[:, 0, :]
        y = pts_ref[:, 1, :]
        z = pts_ref[:, 2, :]
        px = r00 * x + r01 * y + r02 * z + tx
        py = r10 * x + r11 * y + r12 * z + ty
        pz = r20 * x + r21 * y + r22 * z + tz
        # guard exact zero depth (padded lanes carry zero weight anyway)
        pz = jnp.where(pz == 0.0, jnp.float32(1e-12), pz)
        inv_pz = pl.reciprocal(pz, approx=False)
        u = fx * px * inv_pz + cx
        v = fy * py * inv_pz + cy

        ru = gtw_ref[:, 0, :] - u
        rv = gtw_ref[:, 1, :] - v
        wj = gtw_ref[:, 2, :]        # joint_weights * joints_conf (0 on non-joint lanes)
        wv = gtw_ref[:, 3, :]        # vert_weights * verts_conf   (0 on non-vert lanes)

        # ---- joint data term with GMoF robustifier ----
        ru2 = ru * ru
        rv2 = rv * rv
        gmof = rho2 * (ru2 * pl.reciprocal(ru2 + rho2, approx=False)
                       + rv2 * pl.reciprocal(rv2 + rho2, approx=False))
        acc = (wj * wj) * gmof * dw2                     # (B, Npad) per-lane partials

        # ---- priors: one segmented-lane-weight pass merged into the same acc ----
        flat = flat_ref[...]                             # (B, Npad)
        lane = jax.lax.broadcasted_iota(jnp.int32, flat.shape, 1)
        w_prior = jnp.where(lane < o_pe, bw2,
                  jnp.where(lane < o_sh, sw2,
                  jnp.where(lane < o_hd, hw2,
                  jnp.where(lane < o_ang, bend_w, jnp.float32(0.0)))))
        # exp(arg)^2 == exp(2*arg) for the angle-prior lanes; x^2 elsewhere
        vals = jnp.where(lane < o_hd, flat * flat, jnp.exp(2.0 * flat))
        acc = acc + w_prior * vals

        # ---- vertex data term (2D supervision, /100, normalized by sum(wv)) ----
        wru = wv * ru * 0.01
        wrv = wv * rv * 0.01
        vert_acc = wru * wru + wrv * wrv

        # ---- 3 cross-lane reductions total ----
        wv_sum = jnp.sum(wv)
        total = jnp.sum(acc) + dw * jnp.sum(vert_acc) / (wv_sum + 1e-5)

        # TODO(synk): interpenetration term (BVH search_tree + tri_filtering +
        # pen_distance) is data-dependent collision detection with no clean Pallas
        # equivalent; the default coll_loss_weight=0 path (skipped) is reproduced.
        # use_face=False => expression/jaw priors skipped, matching defaults.

        out_ref[0, 0] = total

    return kernel


def _smplify_loss_impl(joints, vertices, gt_joints, gt_verts,
                       joints_conf, joint_weights, verts_conf, vert_weights,
                       pose_embedding, betas, full_pose,
                       left_hand_pose, right_hand_pose,
                       camera_R, camera_t, focal, center,
                       data_weight=1.0, body_pose_weight=1.0, shape_weight=2.0,
                       bending_prior_weight=0.5, hand_prior_weight=1.5, rho=100.0):
    f32 = jnp.float32
    B, J, _ = joints.shape
    V = vertices.shape[1]
    NGT = gt_joints.shape[1]
    N = J + V
    Npad = max(_round_up(N, 128), 128)

    # ---- slab A: 3D points, channel-major, joints|vertices along lanes ----
    pts = jnp.concatenate([joints.astype(f32), vertices.astype(f32)], axis=1)   # (B,N,3)
    pts = jnp.pad(pts, ((0, 0), (0, Npad - N), (0, 0)))
    pts = jnp.transpose(pts, (0, 2, 1))                                         # (B,3,Npad)

    # ---- slab B: GT uv (lane-aligned with projections) + fused weights ----
    gtj_uv = jnp.pad(gt_joints[:, :, :2].astype(f32), ((0, 0), (0, J - NGT), (0, 0)))
    gt_uv = jnp.concatenate([gtj_uv, gt_verts[:, :, :2].astype(f32)], axis=1)   # (B,N,2)
    gt_uv = jnp.pad(gt_uv, ((0, 0), (0, Npad - N), (0, 0)))
    gt_uv = jnp.transpose(gt_uv, (0, 2, 1))                                     # (B,2,Npad)
    wj = jnp.pad((joint_weights * joints_conf).astype(f32), ((0, 0), (0, Npad - NGT)))
    wv = jnp.pad((vert_weights * verts_conf).astype(f32), ((0, 0), (J, Npad - J - V)))
    gtw = jnp.concatenate([gt_uv, wj[:, None, :], wv[:, None, :]], axis=1)      # (B,4,Npad)

    # ---- slab C: flat priors [pose_emb|betas|lh|rh|signed angle args|0-pad] ----
    ang_sign = jnp.array([1.0, -1.0, -1.0, -1.0], dtype=f32)
    ang = jnp.stack([full_pose[:, 55], full_pose[:, 58],
                     full_pose[:, 12], full_pose[:, 15]], axis=1).astype(f32) * ang_sign
    flat = jnp.concatenate([pose_embedding.astype(f32), betas.astype(f32),
                            left_hand_pose.astype(f32), right_hand_pose.astype(f32),
                            ang], axis=1)
    d_flat = flat.shape[1]
    flat = jnp.pad(flat, ((0, 0), (0, Npad - d_flat)))                          # (B,Npad)

    # ---- SMEM scalars: precomputed weight squares + camera params ----
    w_vals = [data_weight * data_weight, data_weight,
              body_pose_weight * body_pose_weight,
              shape_weight * shape_weight,
              bending_prior_weight,
              hand_prior_weight * hand_prior_weight,
              rho * rho, 0.0]
    weights = jnp.stack([jnp.asarray(w, dtype=f32) for w in w_vals])
    cam = jnp.concatenate([camera_R.reshape(-1), camera_t.reshape(-1),
                           focal.reshape(-1), center.reshape(-1)]).astype(f32)

    kernel = _make_kernel(pose_embedding.shape[1], betas.shape[1],
                          left_hand_pose.shape[1] + right_hand_pose.shape[1])

    smem = pl.BlockSpec(memory_space=pltpu.MemorySpace.SMEM)
    vmem = pl.BlockSpec(memory_space=pltpu.MemorySpace.VMEM)

    # No grid: whole problem (<0.2 MiB) stays VMEM-resident; a grid over B with
    # dimension_semantics=("parallel",) only pays off on v7x at much larger B.
    out = pl.pallas_call(
        kernel,
        out_shape=jax.ShapeDtypeStruct((1, 1), jnp.float32),
        in_specs=[smem, smem, vmem, vmem, vmem],
        out_specs=smem,
    )(weights, cam, pts, gtw, flat)
    return out[0, 0]


smplify_loss = jax.jit(_smplify_loss_impl)


def reference_loss(joints, vertices, gt_joints, gt_verts,
                   joints_conf, joint_weights, verts_conf, vert_weights,
                   pose_embedding, betas, full_pose,
                   left_hand_pose, right_hand_pose,
                   camera_R, camera_t, focal, center,
                   data_weight=1.0, body_pose_weight=1.0, shape_weight=2.0,
                   bending_prior_weight=0.5, hand_prior_weight=1.5, rho=100.0):
    def project(pts):
        p = pts @ camera_R.T + camera_t
        return focal * p[..., :2] / p[..., 2:3] + center

    ngt = gt_joints.shape[1]
    proj_j = project(joints)
    w = (joint_weights * joints_conf)[..., None]
    res = gt_joints - proj_j[:, :ngt]
    sq = res ** 2
    jd = rho ** 2 * sq / (sq + rho ** 2)
    joint_loss = jnp.sum(w ** 2 * jd) * data_weight ** 2

    proj_v = project(vertices)
    wv = (vert_weights * verts_conf)[..., None]
    vd = (gt_verts[:, :, :2] - proj_v) / 100.0
    vert_loss = jnp.sum((wv * vd) ** 2 * data_weight) / (jnp.sum(wv) + 1e-5)

    pprior = jnp.sum(pose_embedding ** 2) * body_pose_weight ** 2
    shape_loss = jnp.sum(betas ** 2) * shape_weight ** 2

    bp = full_pose[:, 3:66]
    idxs = jnp.array([52, 55, 9, 12])
    signs = jnp.array([1.0, -1.0, -1.0, -1.0], dtype=jnp.float32)
    ang = jnp.sum(jnp.exp(bp[:, idxs] * signs) ** 2) * bending_prior_weight

    lh = jnp.sum(left_hand_pose ** 2) * hand_prior_weight ** 2
    rh = jnp.sum(right_hand_pose ** 2) * hand_prior_weight ** 2
    return joint_loss + vert_loss + pprior + shape_loss + ang + lh + rh


if __name__ == "__main__":
    key = jax.random.PRNGKey(0)
    B, J, V, NGT = 2, 72, 128, 67
    ks = jax.random.split(key, 12)

    joints = jax.random.normal(ks[0], (B, J, 3), jnp.float32) * 0.5
    vertices = jax.random.normal(ks[1], (B, V, 3), jnp.float32) * 0.5
    gt_joints = jax.random.normal(ks[2], (B, NGT, 2), jnp.float32) * 50.0 + 128.0
    gt_verts = jax.random.normal(ks[3], (B, V, 3), jnp.float32) * 50.0 + 128.0
    joints_conf = jax.random.uniform(ks[4], (B, NGT), jnp.float32)
    joint_weights = jnp.ones((B, NGT), jnp.float32)
    verts_conf = jax.random.uniform(ks[5], (B, V), jnp.float32)
    vert_weights = jnp.ones((B, V), jnp.float32)
    pose_embedding = jax.random.normal(ks[6], (B, 32), jnp.float32) * 0.1
    betas = jax.random.normal(ks[7], (B, 10), jnp.float32) * 0.1
    full_pose = jax.random.normal(ks[8], (B, 69), jnp.float32) * 0.2
    left_hand_pose = jax.random.normal(ks[9], (B, 12), jnp.float32) * 0.1
    right_hand_pose = jax.random.normal(ks[10], (B, 12), jnp.float32) * 0.1

    camera_R = jnp.eye(3, dtype=jnp.float32)
    camera_t = jnp.array([0.0, 0.0, 5.0], jnp.float32)
    focal = jnp.array([500.0, 500.0], jnp.float32)
    center = jnp.array([128.0, 128.0], jnp.float32)

    args = (joints, vertices, gt_joints, gt_verts,
            joints_conf, joint_weights, verts_conf, vert_weights,
            pose_embedding, betas, full_pose,
            left_hand_pose, right_hand_pose,
            camera_R, camera_t, focal, center)

    total = jax.block_until_ready(smplify_loss(*args))
    ref = jax.block_until_ready(reference_loss(*args))
    assert jnp.isfinite(total), total
    assert jnp.allclose(total, ref, rtol=1e-4, atol=1e-2), (total, ref)
    print("KERNEL_OK")
</pallas_src>

<mosaic_0001>
module attributes {stable_mosaic.version = 11 : i64} {
  func.func @kernel(%arg0: memref<8xf32, #tpu.memory_space<smem>>, %arg1: memref<16xf32, #tpu.memory_space<smem>>, %arg2: memref<2x3x256xf32, #tpu.memory_space<vmem>>, %arg3: memref<2x4x256xf32, #tpu.memory_space<vmem>>, %arg4: memref<2x256xf32, #tpu.memory_space<vmem>>, %arg5: memref<1x1xf32, #tpu.memory_space<smem>>) attributes {dimension_semantics = [], scalar_prefetch = 0 : i64, scratch_operands = 0 : i64, tpu.core_type = #tpu.core_type<tc>} {
    %c0 = arith.constant 0 : index
    %0 = memref.load %arg0[%c0] : memref<8xf32, #tpu.memory_space<smem>>
    %c1 = arith.constant 1 : index
    %1 = memref.load %arg0[%c1] : memref<8xf32, #tpu.memory_space<smem>>
    %c2 = arith.constant 2 : index
    %2 = memref.load %arg0[%c2] : memref<8xf32, #tpu.memory_space<smem>>
    %c3 = arith.constant 3 : index
    %3 = memref.load %arg0[%c3] : memref<8xf32, #tpu.memory_space<smem>>
    %c4 = arith.constant 4 : index
    %4 = memref.load %arg0[%c4] : memref<8xf32, #tpu.memory_space<smem>>
    %c5 = arith.constant 5 : index
    %5 = memref.load %arg0[%c5] : memref<8xf32, #tpu.memory_space<smem>>
    %c6 = arith.constant 6 : index
    %6 = memref.load %arg0[%c6] : memref<8xf32, #tpu.memory_space<smem>>
    %c0_0 = arith.constant 0 : index
    %7 = memref.load %arg1[%c0_0] : memref<16xf32, #tpu.memory_space<smem>>
    %c1_1 = arith.constant 1 : index
    %8 = memref.load %arg1[%c1_1] : memref<16xf32, #tpu.memory_space<smem>>
    %c2_2 = arith.constant 2 : index
    %9 = memref.load %arg1[%c2_2] : memref<16xf32, #tpu.memory_space<smem>>
    %c3_3 = arith.constant 3 : index
    %10 = memref.load %arg1[%c3_3] : memref<16xf32, #tpu.memory_space<smem>>
    %c4_4 = arith.constant 4 : index
    %11 = memref.load %arg1[%c4_4] : memref<16xf32, #tpu.memory_space<smem>>
    %c5_5 = arith.constant 5 : index
    %12 = memref.load %arg1[%c5_5] : memref<16xf32, #tpu.memory_space<smem>>
    %c6_6 = arith.constant 6 : index
    %13 = memref.load %arg1[%c6_6] : memref<16xf32, #tpu.memory_space<smem>>
    %c7 = arith.constant 7 : index
    %14 = memref.load %arg1[%c7] : memref<16xf32, #tpu.memory_space<smem>>
    %c8 = arith.constant 8 : index
    %15 = memref.load %arg1[%c8] : memref<16xf32, #tpu.memory_space<smem>>
    %c9 = arith.constant 9 : index
    %16 = memref.load %arg1[%c9] : memref<16xf32, #tpu.memory_space<smem>>
    %c10 = arith.constant 10 : index
    %17 = memref.load %arg1[%c10] : memref<16xf32, #tpu.memory_space<smem>>
    %c11 = arith.constant 11 : index
    %18 = memref.load %arg1[%c11] : memref<16xf32, #tpu.memory_space<smem>>
    %c12 = arith.constant 12 : index
    %19 = memref.load %arg1[%c12] : memref<16xf32, #tpu.memory_space<smem>>
    %c13 = arith.constant 13 : index
    %20 = memref.load %arg1[%c13] : memref<16xf32, #tpu.memory_space<smem>>
    %c14 = arith.constant 14 : index
    %21 = memref.load %arg1[%c14] : memref<16xf32, #tpu.memory_space<smem>>
    %c15 = arith.constant 15 : index
    %22 = memref.load %arg1[%c15] : memref<16xf32, #tpu.memory_space<smem>>
    %c0_7 = arith.constant 0 : index
    %c0_8 = arith.constant 0 : index
    %c0_9 = arith.constant 0 : index
    %23 = vector.load %arg2[%c0_7, %c0_8, %c0_9] : memref<2x3x256xf32, #tpu.memory_space<vmem>>, vector<2x1x256xf32>
    %24 = vector.shape_cast %23 : vector<2x1x256xf32> to vector<2x256xf32>
    %c0_10 = arith.constant 0 : index
    %c1_11 = arith.constant 1 : index
    %c0_12 = arith.constant 0 : index
    %25 = vector.load %arg2[%c0_10, %c1_11, %c0_12] : memref<2x3x256xf32, #tpu.memory_space<vmem>>, vector<2x1x256xf32>
    %26 = vector.shape_cast %25 : vector<2x1x256xf32> to vector<2x256xf32>
    %c0_13 = arith.constant 0 : index
    %c2_14 = arith.constant 2 : index
    %c0_15 = arith.constant 0 : index
    %27 = vector.load %arg2[%c0_13, %c2_14, %c0_15] : memref<2x3x256xf32, #tpu.memory_space<vmem>>, vector<2x1x256xf32>
    %28 = vector.shape_cast %27 : vector<2x1x256xf32> to vector<2x256xf32>
    %29 = vector.broadcast %7 : f32 to vector<2x256xf32>
    %30 = arith.mulf %29, %24 : vector<2x256xf32>
    %31 = vector.broadcast %8 : f32 to vector<2x256xf32>
    %32 = arith.mulf %31, %26 : vector<2x256xf32>
    %33 = arith.addf %30, %32 : vector<2x256xf32>
    %34 = vector.broadcast %9 : f32 to vector<2x256xf32>
    %35 = arith.mulf %34, %28 : vector<2x256xf32>
    %36 = arith.addf %33, %35 : vector<2x256xf32>
    %37 = vector.broadcast %16 : f32 to vector<2x256xf32>
    %38 = arith.addf %36, %37 : vector<2x256xf32>
    %39 = vector.broadcast %10 : f32 to vector<2x256xf32>
    %40 = arith.mulf %39, %24 : vector<2x256xf32>
    %41 = vector.broadcast %11 : f32 to vector<2x256xf32>
    %42 = arith.mulf %41, %26 : vector<2x256xf32>
    %43 = arith.addf %40, %42 : vector<2x256xf32>
    %44 = vector.broadcast %12 : f32 to vector<2x256xf32>
    %45 = arith.mulf %44, %28 : vector<2x256xf32>
    %46 = arith.addf %43, %45 : vector<2x256xf32>
    %47 = vector.broadcast %17 : f32 to vector<2x256xf32>
    %48 = arith.addf %46, %47 : vector<2x256xf32>
    %49 = vector.broadcast %13 : f32 to vector<2x256xf32>
    %50 = arith.mulf %49, %24 : vector<2x256xf32>
    %51 = vector.broadcast %14 : f32 to vector<2x256xf32>
    %52 = arith.mulf %51, %26 : vector<2x256xf32>
    %53 = arith.addf %50, %52 : vector<2x256xf32>
    %54 = vector.broadcast %15 : f32 to vector<2x256xf32>
    %55 = arith.mulf %54, %28 : vector<2x256xf32>
    %56 = arith.addf %53, %55 : vector<2x256xf32>
    %57 = vector.broadcast %18 : f32 to vector<2x256xf32>
    %58 = arith.addf %56, %57 : vector<2x256xf32>
    %cst = arith.constant 0.000000e+00 : f32
    %59 = vector.broadcast %cst : f32 to vector<2x256xf32>
    %60 = arith.cmpf oeq, %58, %59 : vector<2x256xf32>
    %cst_16 = arith.constant 9.99999996E-13 : f32
    %61 = vector.broadcast %cst_16 : f32 to vector<2x256xf32>
    %62 = arith.select %60, %61, %58 : vector<2x256xi1>, vector<2x256xf32>
    %63 = tpu.reciprocal %62 : vector<2x256xf32> -> vector<2x256xf32>
    %64 = vector.broadcast %19 : f32 to vector<2x256xf32>
    %65 = arith.mulf %64, %38 : vector<2x256xf32>
    %66 = arith.mulf %65, %63 : vector<2x256xf32>
    %67 = vector.broadcast %21 : f32 to vector<2x256xf32>
    %68 = arith.addf %66, %67 : vector<2x256xf32>
    %69 = vector.broadcast %20 : f32 to vector<2x256xf32>
    %70 = arith.mulf %69, %48 : vector<2x256xf32>
    %71 = arith.mulf %70, %63 : vector<2x256xf32>
    %72 = vector.broadcast %22 : f32 to vector<2x256xf32>
    %73 = arith.addf %71, %72 : vector<2x256xf32>
    %c0_17 = arith.constant 0 : index
    %c0_18 = arith.constant 0 : index
    %c0_19 = arith.constant 0 : index
    %74 = vector.load %arg3[%c0_17, %c0_18, %c0_19] : memref<2x4x256xf32, #tpu.memory_space<vmem>>, vector<2x1x256xf32>
    %75 = vector.shape_cast %74 : vector<2x1x256xf32> to vector<2x256xf32>
    %76 = arith.subf %75, %68 : vector<2x256xf32>
    %c0_20 = arith.constant 0 : index
    %c1_21 = arith.constant 1 : index
    %c0_22 = arith.constant 0 : index
    %77 = vector.load %arg3[%c0_20, %c1_21, %c0_22] : memref<2x4x256xf32, #tpu.memory_space<vmem>>, vector<2x1x256xf32>
    %78 = vector.shape_cast %77 : vector<2x1x256xf32> to vector<2x256xf32>
    %79 = arith.subf %78, %73 : vector<2x256xf32>
    %c0_23 = arith.constant 0 : index
    %c2_24 = arith.constant 2 : index
    %c0_25 = arith.constant 0 : index
    %80 = vector.load %arg3[%c0_23, %c2_24, %c0_25] : memref<2x4x256xf32, #tpu.memory_space<vmem>>, vector<2x1x256xf32>
    %81 = vector.shape_cast %80 : vector<2x1x256xf32> to vector<2x256xf32>
    %c0_26 = arith.constant 0 : index
    %c3_27 = arith.constant 3 : index
    %c0_28 = arith.constant 0 : index
    %82 = vector.load %arg3[%c0_26, %c3_27, %c0_28] : memref<2x4x256xf32, #tpu.memory_space<vmem>>, vector<2x1x256xf32>
    %83 = vector.shape_cast %82 : vector<2x1x256xf32> to vector<2x256xf32>
    %84 = arith.mulf %76, %76 : vector<2x256xf32>
    %85 = arith.mulf %79, %79 : vector<2x256xf32>
    %86 = vector.broadcast %6 : f32 to vector<2x256xf32>
    %87 = arith.addf %84, %86 : vector<2x256xf32>
    %88 = tpu.reciprocal %87 : vector<2x256xf32> -> vector<2x256xf32>
    %89 = arith.mulf %84, %88 : vector<2x256xf32>
    %90 = vector.broadcast %6 : f32 to vector<2x256xf32>
    %91 = arith.addf %85, %90 : vector<2x256xf32>
    %92 = tpu.reciprocal %91 : vector<2x256xf32> -> vector<2x256xf32>
    %93 = arith.mulf %85, %92 : vector<2x256xf32>
    %94 = arith.addf %89, %93 : vector<2x256xf32>
    %95 = vector.broadcast %6 : f32 to vector<2x256xf32>
    %96 = arith.mulf %95, %94 : vector<2x256xf32>
    %97 = arith.mulf %81, %81 : vector<2x256xf32>
    %98 = arith.mulf %97, %96 : vector<2x256xf32>
    %99 = vector.broadcast %0 : f32 to vector<2x256xf32>
    %100 = arith.mulf %98, %99 : vector<2x256xf32>
    %c0_29 = arith.constant 0 : index
    %c0_30 = arith.constant 0 : index
    %101 = vector.load %arg4[%c0_29, %c0_30] : memref<2x256xf32, #tpu.memory_space<vmem>>, vector<2x256xf32>
    %102 = tpu.iota {dimensions = array<i32: 1>} : vector<2x256xi32>
    %c32_i32 = arith.constant 32 : i32
    %103 = vector.broadcast %c32_i32 : i32 to vector<2x256xi32>
    %104 = arith.cmpi slt, %102, %103 : vector<2x256xi32>
    %c42_i32 = arith.constant 42 : i32
    %105 = vector.broadcast %c42_i32 : i32 to vector<2x256xi32>
    %106 = arith.cmpi slt, %102, %105 : vector<2x256xi32>
    %c66_i32 = arith.constant 66 : i32
    %107 = vector.broadcast %c66_i32 : i32 to vector<2x256xi32>
    %108 = arith.cmpi slt, %102, %107 : vector<2x256xi32>
    %c70_i32 = arith.constant 70 : i32
    %109 = vector.broadcast %c70_i32 : i32 to vector<2x256xi32>
    %110 = arith.cmpi slt, %102, %109 : vector<2x256xi32>
    %cst_31 = arith.constant 0.000000e+00 : f32
    %111 = vector.broadcast %4 : f32 to vector<2x256xf32>
    %112 = vector.broadcast %cst_31 : f32 to vector<2x256xf32>
    %113 = arith.select %110, %111, %112 : vector<2x256xi1>, vector<2x256xf32>
    %114 = vector.broadcast %5 : f32 to vector<2x256xf32>
    %115 = arith.select %108, %114, %113 : vector<2x256xi1>, vector<2x256xf32>
    %116 = vector.broadcast %3 : f32 to vector<2x256xf32>
    %117 = arith.select %106, %116, %115 : vector<2x256xi1>, vector<2x256xf32>
    %118 = vector.broadcast %2 : f32 to vector<2x256xf32>
    %119 = arith.select %104, %118, %117 : vector<2x256xi1>, vector<2x256xf32>
    %c66_i32_32 = arith.constant 66 : i32
    %120 = vector.broadcast %c66_i32_32 : i32 to vector<2x256xi32>
    %121 = arith.cmpi slt, %102, %120 : vector<2x256xi32>
    %122 = arith.mulf %101, %101 : vector<2x256xf32>
    %cst_33 = arith.constant 2.000000e+00 : f32
    %123 = vector.broadcast %cst_33 : f32 to vector<2x256xf32>
    %124 = arith.mulf %123, %101 : vector<2x256xf32>
    %125 = math.exp %124 : vector<2x256xf32>
    %126 = arith.select %121, %122, %125 : vector<2x256xi1>, vector<2x256xf32>
    %127 = arith.mulf %119, %126 : vector<2x256xf32>
    %128 = arith.addf %100, %127 : vector<2x256xf32>
    %129 = arith.mulf %83, %76 : vector<2x256xf32>
    %cst_34 = arith.constant 0.00999999977 : f32
    %130 = vector.broadcast %cst_34 : f32 to vector<2x256xf32>
    %131 = arith.mulf %129, %130 : vector<2x256xf32>
    %132 = arith.mulf %83, %79 : vector<2x256xf32>
    %cst_35 = arith.constant 0.00999999977 : f32
    %133 = vector.broadcast %cst_35 : f32 to vector<2x256xf32>
    %134 = arith.mulf %132, %133 : vector<2x256xf32>
    %135 = arith.mulf %131, %131 : vector<2x256xf32>
    %136 = arith.mulf %134, %134 : vector<2x256xf32>
    %137 = arith.addf %135, %136 : vector<2x256xf32>
    %138 = vector.shape_cast %83 : vector<2x256xf32> to vector<1x2x256xf32>
    %cst_36 = arith.constant dense<0.000000e+00> : vector<1xf32>
    %139 = vector.multi_reduction <add>, %138, %cst_36 [1, 2] : vector<1x2x256xf32> to vector<1xf32>
    %140 = vector.shape_cast %139 : vector<1xf32> to vector<1x1x1xf32>
    %141 = vector.extract %140[0, 0, 0] : f32 from vector<1x1x1xf32>
    %142 = vector.shape_cast %128 : vector<2x256xf32> to vector<1x2x256xf32>
    %cst_37 = arith.constant dense<0.000000e+00> : vector<1xf32>
    %143 = vector.multi_reduction <add>, %142, %cst_37 [1, 2] : vector<1x2x256xf32> to vector<1xf32>
    %144 = vector.shape_cast %143 : vector<1xf32> to vector<1x1x1xf32>
    %145 = vector.extract %144[0, 0, 0] : f32 from vector<1x1x1xf32>
    %146 = vector.shape_cast %137 : vector<2x256xf32> to vector<1x2x256xf32>
    %cst_38 = arith.constant dense<0.000000e+00> : vector<1xf32>
    %147 = vector.multi_reduction <add>, %146, %cst_38 [1, 2] : vector<1x2x256xf32> to vector<1xf32>
    %148 = vector.shape_cast %147 : vector<1xf32> to vector<1x1x1xf32>
    %149 = vector.extract %148[0, 0, 0] : f32 from vector<1x1x1xf32>
    %150 = arith.mulf %1, %149 : f32
    %cst_39 = arith.constant 9.99999974E-6 : f32
    %151 = arith.addf %141, %cst_39 : f32
    %152 = arith.divf %150, %151 : f32
    %153 = arith.addf %145, %152 : f32
    %c0_40 = arith.constant 0 : index
    %c0_41 = arith.constant 0 : index
    %154 = memref.load %arg5[%c0_40, %c0_41] : memref<1x1xf32, #tpu.memory_space<smem>>
    memref.store %153, %arg5[%c0_40, %c0_41] : memref<1x1xf32, #tpu.memory_space<smem>>
    return
  }
}

</mosaic_0001>

<bundles_post_ra>
// kernel: mul.6
= control target key start
LH: loop header
LB: loop body
LE: loop exit
PB: predicated region body
PF: predicated region fallthrough
CT: control target
= control target key end

     0   :  { %s34_s0 = inlined_call_operand.vmem [shape: f32[2,67], index: 0, kind: input, shape index: {}]   ;;  %s35_s1 = inlined_call_operand.vmem [shape: f32[2,67], index: 1, kind: input, shape index: {}]   ;;  %s36_s2 = inlined_call_operand.vmem [shape: f32[2,67], index: 2, kind: output, shape index: {}]  }
   0x1   :  { %v3_v0 = vld [vmem:[%s34_s0] sm:$0x3] }
   0x2   :  { %v4_v1 = vld [vmem:[%s35_s1] sm:$0x3] }
   0x3   :  { %v7_v2 = vmul.f32 %v4_v1, %v3_v0 }
   0x5   :  { %9 = vst [vmem:[%s36_s2] sm:$0x3] %v7_v2 }

// kernel: mul.7
= control target key start
LH: loop header
LB: loop body
LE: loop exit
PB: predicated region body
PF: predicated region fallthrough
CT: control target
= control target key end

     0   :  { %s34_s0 = inlined_call_operand.vmem [shape: f32[2,128], index: 0, kind: input, shape index: {}]   ;;  %s35_s1 = inlined_call_operand.vmem [shape: f32[2,128], index: 1, kind: input, shape index: {}]   ;;  %s36_s2 = inlined_call_operand.vmem [shape: f32[2,128], index: 2, kind: output, shape index: {}]  }
   0x1   :  { %v3_v0 = vld [vmem:[%s34_s0] sm:$0x3] }
   0x2   :  { %v4_v1 = vld [vmem:[%s35_s1] sm:$0x3] }
   0x3   :  { %v7_v2 = vmul.f32 %v4_v1, %v3_v0 }
   0x5   :  { %9 = vst [vmem:[%s36_s2] sm:$0x3] %v7_v2 }

// kernel: _smplify_loss_impl.1
= control target key start
LH: loop header
LB: loop body
LE: loop exit
PB: predicated region body
PF: predicated region fallthrough
CT: control target
= control target key end

     0   :  { %10 = vsyncpa [#allocation4], 0  ;;  %s762_s0 = inlined_call_operand.vmem [shape: f32[8], index: 0, kind: input, shape index: {}]   ;;  %s763_s1 = inlined_call_operand.vmem [shape: f32[16], index: 1, kind: input, shape index: {}]   ;;  %s764_s2 = inlined_call_operand.vmem [shape: f32[2,3,256], index: 2, kind: input, shape index: {}]   ;;  %s765_s3 = inlined_call_operand.vmem [shape: f32[2,4,256], index: 3, kind: input, shape index: {}]   ;;  %s766_s4 = inlined_call_operand.vmem [shape: f32[2,256], index: 4, kind: input, shape index: {}]   ;;  %s767_s5 = inlined_call_operand.hbm [shape: f32[1,1], index: 5, kind: output, shape index: {}]  }
   0x1   :  { %11 = vsyncpa [#allocation6], 0 }
   0x2   :  { %12 = vsyncpa [#allocation3], 0  ;;  %s19_s20 = sshll.u32 %s762_s0, 4  ;;  %s29_s23 = sshll.u32 %s763_s1, 4  ;;  %s20_s20 = int_to_ptr.vmem [resolvable:$true] %s19_s20  ;;  %s30_s23 = int_to_ptr.vmem [resolvable:$true] %s29_s23 }
   0x3   :  { %s498_s24 = scalar_lea.vmem %s20_s20, 16  ;;  %p503_p1 = scmp.lt.s32.totalorder %s20_s20, %s20_s20 }
   0x4   :  { %p499_p0 = scmp.ne.s32.totalorder %s20_s20, %s498_s24  ;;  %p504_p2 = scmp.lt.s32.totalorder %s498_s24, %s498_s24 }
   0x6   :  { %p505_p3 = por %p504_p2, %p503_p1 }
   0x8   :  { %p506_p4 = pnand %p505_p3, %p499_p0 }
   0xa   :  { %509 = shalt.err (!%p506_p4)
}
   0xb   :  { %s538_s25 = smov [#allocation2]   ;;  %s510_s26 = scalar_lea.vmem %s30_s23, 16 }
   0xc   :  { %22 = dma.vmem_to_smem %s20_s20, 16, %s538_s25, [#allocation4]  }
   0xd   :  { %p511_p5 = scmp.ne.s32.totalorder %s30_s23, %s510_s26  ;;  %p515_p6 = scmp.lt.s32.totalorder %s30_s23, %s30_s23 }
   0xe   :  { %p516_p7 = scmp.lt.s32.totalorder %s510_s26, %s510_s26 }
  0x10   :  { %p517_p8 = por %p516_p7, %p515_p6 }
  0x12   :  { %p518_p9 = pnand %p517_p8, %p511_p5 }
  0x14   :  { %521 = shalt.err (!%p518_p9)
}
  0x15   :  { %s539_s0 = smov [#allocation5]  }
  0x16   :  { %32 = dma.vmem_to_smem %s30_s23, 16, %s539_s0, [#allocation6]  }
  0x17   :  { %532 = dma.done.wait [#allocation4], 16  }
  0x18   :  { %533 = vsyncadd [#allocation4], 4294967280 }
  0x19   :  { %534 = dma.done.wait [#allocation6], 16  }
  0x1a   :  { %535 = vsyncadd [#allocation6], 4294967280 }
  0x1b   :  { %45 = sfence }
  0x1c   :  { %v582_v0 = vld [vmem:[%s765_s3 + $0x3] ss:$4 sm:$0x3]  ;;  %v198_v1 = vlaneseq  ;;  %v587_v2 = vld [vmem:[%s765_s3 + $0xb] ss:$4 sm:$0x3] }
  0x1d   :  { %v540_v4 = vmov 1966171168   ;;  %v296_v7 = vcombine.low %v582_v0, %v587_v2  ;;  %s594_s30 = sld [smem:[#allocation5]]  ;;  %s599_s6 = sld [smem:[#allocation5 + $0x1]]  ;;  %vm321_vm0 = vcmask 1041408  }
  0x1e   :  { %v590_v3 = vshrl.u32 %v198_v1, 7  ;;  %v255_v5 = vunpack.c.l.s4 %v540_v4  ;;  %s601_s7 = sld [smem:[#allocation5 + $0x2]]  ;;  %s603_s8 = sld [smem:[#allocation5 + $0x3]]  ;;  %v69_v15 = vld [vmem:[%s764_s2] ss:$4 sm:$0x3] }
  0x1f   :  { %s605_s9 = sld [smem:[#allocation5 + $0x4]]  ;;  %s608_s10 = sld [smem:[#allocation5 + $0x5]]  ;;  %v457_v19 = vld [vmem:[%s764_s2 + $0x8] ss:$4 sm:$0x3]  ;;  %v667_v62 = vand.u32 127, %v198_v1 }
  0x20   :  { %v256_v6 = vunpack.c.0.s8 %v255_v5  ;;  %s610_s11 = sld [smem:[#allocation5 + $0x6]]  ;;  %s612_s12 = sld [smem:[#allocation5 + $0x7]]  ;;  %v458_v20 = vld [vmem:[%s764_s2 + $0x1] ss:$4 sm:$0x3] }
  0x21   :  { %s614_s13 = sld [smem:[#allocation5 + $0x8]]  ;;  %s620_s14 = sld [smem:[#allocation5 + $0xb]]  ;;  %v459_v23 = vld [vmem:[%s764_s2 + $0x9] ss:$4 sm:$0x3]  ;;  %vm207_vm3 = vcmp.lt.s32.totalorder %v667_v62, 70 }
  0x22   :  { %v597_v8 = vsub.s32 %v256_v6, %v590_v3  ;;  %v460_v24 = vld [vmem:[%s764_s2 + $0x2] ss:$4 sm:$0x3]  ;;  %v461_v27 = vld [vmem:[%s764_s2 + $0xa] ss:$4 sm:$0x3] }
  0x23   :  { %v80_v16 = vstv %s594_s30  ;;  %v83_v17 = vstv %s599_s6  ;;  %s649_s0 = sld [smem:[#allocation5 + $0x9]]  ;;  %v654_v39 = vld [vmem:[%s766_s4] sm:$0xf]  ;;  %s656_s2 = sld [smem:[#allocation5 + $0xa]]  ;;  %v541_v1 = vmov 1983009808  }
  0x24   :  { %v303_v9 = vrot.slane %v296_v7, %v597_v8  ;;  %v88_v21 = vstv %s601_s7  ;;  %v96_v22 = vstv %s603_s8  ;;  %v81_v31 = vmul.f32 %v80_v16, %v69_v15  ;;  %s660_s4 = sld [smem:[#allocation2 + $0x4]]  ;;  %s664_s29 = sld [smem:[#allocation5 + $0xd]] }
  0x25   :  { %v99_v25 = vstv %s605_s9  ;;  %v104_v26 = vstv %s608_s10  ;;  %v82_v32 = vmul.f32 %v457_v19, %v80_v16  ;;  %v97_v33 = vmul.f32 %v96_v22, %v69_v15  ;;  %s662_s28 = sld [smem:[#allocation5 + $0xc]]  ;;  %s670_s30 = sld [smem:[#allocation2 + $0x5]] }
  0x26   :  { %v304_v10 = vcombine.high %v303_v9, %v303_v9  ;;  %v311_v11 = vrot.slane %v303_v9, %v597_v8  ;;  %v112_v28 = vstv %s610_s11  ;;  %v115_v29 = vstv %s612_s12  ;;  %s673_s6 = sld [smem:[#allocation2 + $0x3]]  ;;  %s675_s7 = sld [smem:[#allocation5 + $0xe]] }
  0x27   :  { %v120_v30 = vstv %s614_s13  ;;  %v113_v34 = vmul.f32 %v112_v28, %v69_v15  ;;  %v84_v35 = vmul.f32 %v458_v20, %v83_v17  ;;  %v114_v36 = vmul.f32 %v457_v19, %v112_v28  ;;  %s677_s8 = sld [smem:[#allocation5 + $0xf]]  ;;  %s680_s9 = sld [smem:[#allocation2 + $0x2]] }
  0x28   :  { %v318_v12 = vrot.slane %v304_v10, %v597_v8  ;;  %v322_v13 = vsel %vm321_vm0, %v311_v11, 0.0  ;;  %v116_v37 = vmul.f32 %v458_v20, %v115_v29  ;;  %v117_v38 = vmul.f32 %v459_v23, %v115_v29  ;;  %s687_s10 = sld [smem:[#allocation2 + $0x6]]  ;;  %s46_s19 = sld [smem:[#allocation2]] }
  0x29   :  { %v85_v40 = vmul.f32 %v459_v23, %v83_v17  ;;  %v100_v41 = vmul.f32 %v458_v20, %v99_v25  ;;  %v121_v42 = vmul.f32 %v460_v24, %v120_v30  ;;  %v122_v43 = vmul.f32 %v461_v27, %v120_v30  ;;  %s436_s25 = sld [smem:[#allocation2 + $0x1]] }
  0x2a   :  { %v323_v14 = vsel %vm321_vm0, %v318_v12, 0.0  ;;  %v98_v44 = vmul.f32 %v457_v19, %v96_v22  ;;  %v101_v45 = vmul.f32 %v459_v23, %v99_v25  ;;  %v118_v46 = vadd.f32 %v116_v37, %v113_v34 }
  0x2b   :  { %v324_v18 = vadd.f32 %v323_v14, %v322_v13  ;;  %v119_v47 = vadd.f32 %v117_v38, %v114_v36  ;;  %v125_v48 = vstv %s620_s14  ;;  %v222_v49 = vmul.f32 2.0, %v654_v39 }
  0x2c   :  { %v86_v50 = vadd.f32 %v84_v35, %v81_v31  ;;  %v89_v51 = vmul.f32 %v460_v24, %v88_v21  ;;  %v123_v52 = vadd.f32 %v121_v42, %v118_v46  ;;  %v87_v54 = vadd.f32 %v85_v40, %v82_v32  ;;  %v463_v42 = vld [vmem:[%s765_s3 + $0x1] ss:$4 sm:$0x3] }
  0x2d   :  { %325 = vadd.xlane.f32.xlu0 %v324_v18  ;;  %v124_v53 = vadd.f32 %v122_v43, %v119_v47  ;;  %v90_v55 = vmul.f32 %v461_v27, %v88_v21  ;;  %v102_v56 = vadd.f32 %v100_v41, %v97_v33  ;;  %v105_v57 = vmul.f32 %v460_v24, %v104_v26  ;;  %v150_v41 = vld [vmem:[%s765_s3] ss:$4 sm:$0x3] }
  0x2e   :  { %v103_v58 = vadd.f32 %v101_v45, %v98_v44  ;;  %v106_v59 = vmul.f32 %v461_v27, %v104_v26  ;;  %v126_v60 = vadd.f32 %v125_v48, %v123_v52  ;;  %v93_v63 = vstv %s649_s0 }
  0x2f   :  { %v127_v61 = vadd.f32 %v125_v48, %v124_v53  ;;  %v223_v4 = vmul.f32 1.442695, %v222_v49  ;;  %v91_v5 = vadd.f32 %v89_v51, %v86_v50  ;;  %v107_v6 = vadd.f32 %v105_v57, %v102_v56  ;;  %v464_v48 = vld [vmem:[%s765_s3 + $0x9] ss:$4 sm:$0x3] }
  0x30   :  { %vm128_vm1 = vcmp.eq.f32.partialorder %v126_v60, 0.0  ;;  %v92_v10 = vadd.f32 %v90_v55, %v87_v54  ;;  %v108_v11 = vadd.f32 %v106_v59, %v103_v58  ;;  %v109_v12 = vstv %s656_s2 }
  0x31   :  { %vm129_vm2 = vcmp.eq.f32.partialorder %v127_v61, 0.0  ;;  %v130_v7 = vsel %vm128_vm1, 1e-12, %v126_v60  ;;  %v227_v13 = vunpack.c.l.s4 %v541_v1  ;;  %v94_v14 = vadd.f32 %v93_v63, %v91_v5 }
  0x32   :  { %v131_v9 = vsel %vm129_vm2, 1e-12, %v127_v61  ;;  %482 = vrcp.f32 %v130_v7  ;;  %v110_v15 = vadd.f32 %v109_v12, %v107_v6  ;;  %v209_v16 = vstv %s660_s4 }
  0x33   :  { %484 = vrcp.f32 %v131_v9  ;;  %v95_v17 = vadd.f32 %v93_v63, %v92_v10  ;;  %v111_v18 = vadd.f32 %v109_v12, %v108_v11  ;;  %v134_v19 = vstv %s662_s28 }
  0x34   :  { %486 = vpow2.f32 %v223_v4  ;;  %v142_v20 = vstv %s664_s29  ;;  %vm205_vm4 = vcmp.lt.s32.totalorder %v667_v62, 66  ;;  %v210_v21 = vsel %vm207_vm3, %v209_v16, 0.0 }
  0x35   :  { %v212_v22 = vstv %s670_s30  ;;  %v135_v23 = vmul.f32 %v134_v19, %v94_v14  ;;  %v143_v24 = vmul.f32 %v142_v20, %v110_v15  ;;  %v136_v25 = vmul.f32 %v134_v19, %v95_v17  ;;  %s522_s30 = scalar_lea.hbm %s767_s5, 16 }
  0x36   :  { %v144_v26 = vmul.f32 %v142_v20, %v111_v18  ;;  %v228_v27 = vunpack.c.0.s8 %v227_v13  ;;  %vm203_vm5 = vcmp.lt.s32.totalorder %v667_v62, 42  ;;  %v213_v28 = vsel %vm205_vm4, %v212_v22, %v210_v21  ;;  %p523_p10 = scmp.ne.s32.totalorder %s767_s5, %s522_s30  ;;  %p526_p11 = scmp.lt.u32.totalorder %s522_s30, %s767_s5 }
  0x37   :  { %v215_v29 = vstv %s673_s6  ;;  %v139_v31 = vstv %s675_s7  ;;  %v147_v32 = vstv %s677_s8  ;;  %vm201_vm6 = vcmp.lt.s32.totalorder %v667_v62, 32 }
  0x38   :  { %v218_v36 = vstv %s680_s9  ;;  %v221_v37 = vmul.f32 %v654_v39, %v654_v39  ;;  %v216_v43 = vsel %vm203_vm5, %v215_v29, %v213_v28  ;;  %v231_v44 = vsub.s32 %v228_v27, %v590_v3  ;;  %v462_v39 = vld [vmem:[%s765_s3 + $0x8] ss:$4 sm:$0x3]  ;;  %p528_p12 = pnand %p526_p11, %p523_p10 }
  0x39   :  { %v715_v53 = vstv %s687_s10  ;;  %v219_v3 = vsel %vm201_vm6, %v218_v36, %v216_v43 }
  0x3a   :  { %v232_v56 = vrot.slane %v221_v37, %v231_v44 }
  0x3c   :  { %v483_v30 = vpop.eup %482 }
  0x3d   :  { %v485_v33 = vpop.eup %484  ;;  %v137_v34 = vmul.f32 %v483_v30, %v135_v23  ;;  %v145_v35 = vmul.f32 %v483_v30, %v143_v24 }
  0x3e   :  { %v138_v38 = vmul.f32 %v485_v33, %v136_v25  ;;  %v146_v40 = vmul.f32 %v485_v33, %v144_v26  ;;  %v487_v45 = vpop.eup %486 }
  0x3f   :  { %v140_v46 = vadd.f32 %v139_v31, %v137_v34  ;;  %v148_v47 = vadd.f32 %v147_v32, %v145_v35  ;;  %v243_v57 = vrot.slane %v487_v45, %v231_v44  ;;  %v465_v34 = vld [vmem:[%s765_s3 + $0x2] ss:$4 sm:$0x3] }
  0x40   :  { %v141_v49 = vadd.f32 %v139_v31, %v138_v38  ;;  %v149_v50 = vadd.f32 %v147_v32, %v146_v40  ;;  %v466_v40 = vld [vmem:[%s765_s3 + $0xa] ss:$4 sm:$0x3]  ;;  %v190_v44 = vmul.f32 %v465_v34, %v465_v34 }
  0x41   :  { %v153_v51 = vsub.f32 %v150_v41, %v140_v46  ;;  %v159_v52 = vsub.f32 %v463_v42, %v148_v47  ;;  %v244_v16 = vcombine.high %v243_v57, %v243_v57  ;;  %v191_v46 = vmul.f32 %v466_v40, %v466_v40 }
  0x42   :  { %v154_v54 = vsub.f32 %v462_v39, %v141_v49  ;;  %v160_v55 = vsub.f32 %v464_v48, %v149_v50  ;;  %v194_v49 = vstv %s46_s19 }
  0x43   :  { %v169_v58 = vmul.f32 %v153_v51, %v153_v51  ;;  %v171_v59 = vmul.f32 %v159_v52, %v159_v52  ;;  %v280_v60 = vmul.f32 %v582_v0, %v153_v51  ;;  %v284_v61 = vmul.f32 %v582_v0, %v159_v52 }
  0x44   :  { %v170_v63 = vmul.f32 %v154_v54, %v154_v54  ;;  %v172_v4 = vmul.f32 %v160_v55, %v160_v55  ;;  %v281_v5 = vmul.f32 %v587_v2, %v154_v54  ;;  %v285_v6 = vmul.f32 %v587_v2, %v160_v55 }
  0x45   :  { %v174_v7 = vadd.f32 %v715_v53, %v169_v58  ;;  %v180_v9 = vadd.f32 %v715_v53, %v171_v59  ;;  %v282_v10 = vmul.f32 0.01, %v280_v60  ;;  %v286_v11 = vmul.f32 0.01, %v284_v61 }
  0x46   :  { %v175_v12 = vadd.f32 %v715_v53, %v170_v63  ;;  %v181_v1 = vadd.f32 %v715_v53, %v172_v4  ;;  %v283_v13 = vmul.f32 0.01, %v281_v5  ;;  %v287_v14 = vmul.f32 0.01, %v285_v6 }
  0x47   :  { %488 = vrcp.f32 %v174_v7  ;;  %v288_v0 = vmul.f32 %v282_v10, %v282_v10  ;;  %v290_v15 = vmul.f32 %v286_v11, %v286_v11  ;;  %v247_v2 = vsel %vm205_vm4, %v232_v56, %v243_v57 }
  0x48   :  { %490 = vrcp.f32 %v175_v12  ;;  %v289_v17 = vmul.f32 %v283_v13, %v283_v13  ;;  %v291_v18 = vmul.f32 %v287_v14, %v287_v14  ;;  %v249_v21 = vmul.f32 %v247_v2, %v219_v3 }
  0x49   :  { %492 = vrcp.f32 %v180_v9  ;;  %v292_v19 = vadd.f32 %v290_v15, %v288_v0  ;;  %v250_v22 = vmul.f32 0.0, %v244_v16 }
  0x4a   :  { %494 = vrcp.f32 %v181_v1  ;;  %v293_v20 = vadd.f32 %v291_v18, %v289_v17 }
  0x4b   :  { %v253_v25 = vcombine.low %v249_v21, %v250_v22 }
  0x4c   :  { %v375_v23 = vcombine.low %v292_v19, %v293_v20 }
  0x4d   :  { %v260_v35 = vrot.slane %v253_v25, %v597_v8 }
  0x4e   :  { %v382_v24 = vrot.slane %v375_v23, %v597_v8 }
  0x4f   :  { %v261_v47 = vcombine.high %v260_v35, %v260_v35  ;;  %v268_v51 = vrot.slane %v260_v35, %v597_v8 }
  0x50   :  { %v383_v26 = vcombine.high %v382_v24, %v382_v24  ;;  %v390_v27 = vrot.slane %v382_v24, %v597_v8 }
  0x51   :  { %v489_v28 = vpop.eup %488  ;;  %v275_v3 = vrot.slane %v261_v47, %v597_v8 }
  0x52   :  { %v491_v29 = vpop.eup %490  ;;  %v178_v30 = vmul.f32 %v489_v28, %v169_v58  ;;  %v397_v62 = vrot.slane %v383_v26, %v597_v8  ;;  %v400_v31 = vsel %vm321_vm0, %v390_v27, 0.0 }
  0x53   :  { %v493_v32 = vpop.eup %492  ;;  %v179_v33 = vmul.f32 %v491_v29, %v170_v63 }
  0x54   :  { %v495_v36 = vpop.eup %494  ;;  %v184_v37 = vmul.f32 %v493_v32, %v171_v59  ;;  %v401_v38 = vsel %vm321_vm0, %v397_v62, 0.0 }
  0x55   :  { %v185_v41 = vmul.f32 %v495_v36, %v172_v4  ;;  %v402_v42 = vadd.f32 %v401_v38, %v400_v31 }
  0x56   :  { %v186_v43 = vadd.f32 %v184_v37, %v178_v30 }
  0x57   :  { %403 = vadd.xlane.f32.xlu1 %v402_v42  ;;  %v187_v45 = vadd.f32 %v185_v41, %v179_v33 }
  0x58   :  { %v188_v39 = vmul.f32 %v186_v43, %v715_v53 }
  0x59   :  { %v189_v48 = vmul.f32 %v187_v45, %v715_v53 }
  0x5a   :  { %v192_v50 = vmul.f32 %v190_v44, %v188_v39 }
  0x5b   :  { %v193_v52 = vmul.f32 %v191_v46, %v189_v48 }
  0x5c   :  { %v195_v54 = vmul.f32 %v194_v49, %v192_v50 }
  0x5d   :  { %v196_v55 = vmul.f32 %v194_v49, %v193_v52 }
  0x5e   :  { %v278_v56 = vadd.f32 %v268_v51, %v195_v54 }
  0x5f   :  { %v279_v57 = vadd.f32 %v275_v3, %v196_v55 }
  0x61   :  { %v336_v58 = vcombine.low %v278_v56, %v279_v57 }
  0x63   :  { %v343_v59 = vrot.slane %v336_v58, %v597_v8 }
  0x65   :  { %v344_v60 = vcombine.high %v343_v59, %v343_v59  ;;  %v351_v61 = vrot.slane %v343_v59, %v597_v8 }
  0x67   :  { %v358_v63 = vrot.slane %v344_v60, %v597_v8  ;;  %v361_v53 = vsel %vm321_vm0, %v351_v61, 0.0 }
  0x69   :  { %v362_v4 = vsel %vm321_vm0, %v358_v63, 0.0 }
  0x6a   :  { %v363_v5 = vadd.f32 %v362_v4, %v361_v53 }
  0x6c   :  { %364 = vadd.xlane.f32.xlu0 %v363_v5 }
  0xba   :  { %v326_v6 = vpop.xlane.xlu0 %325 }
  0xbb   :  { %v327_v7 = vrot.slane %v326_v6, 4 }
  0xbd   :  { %v328_v9 = vadd.f32 %v327_v7, %v326_v6 }
  0xbf   :  { %v329_v10 = vrot.slane %v328_v9, 2 }
  0xc1   :  { %v330_v11 = vadd.f32 %v329_v10, %v328_v9 }
  0xc3   :  { %v331_v12 = vrot.slane %v330_v11, 1 }
  0xc5   :  { %v332_v1 = vadd.f32 %v331_v12, %v330_v11 }
  0xc7   :  { %469 = vpush %v332_v1 }
  0xe4   :  { %v404_v13 = vpop.xlane.xlu1 %403 }
  0xe5   :  { %v405_v14 = vrot.slane %v404_v13, 4 }
  0xe7   :  { %v406_v0 = vadd.f32 %v405_v14, %v404_v13 }
  0xe9   :  { %v407_v8 = vrot.slane %v406_v0, 2 }
  0xeb   :  { %v408_v18 = vadd.f32 %v407_v8, %v406_v0 }
  0xed   :  { %v409_v20 = vrot.slane %v408_v18, 1 }
  0xef   :  { %v410_v23 = vadd.f32 %v409_v20, %v408_v18 }
  0xf8   :  { %s470_s3 = spop %469 }
  0xf9   :  { %s413_s24 = sadd.f32 1e-05, %s470_s3  ;;  %v365_v16 = vpop.xlane.xlu0 %364 }
  0xfa   :  { %v366_v17 = vrot.slane %v365_v16, 4 }
  0xfb   :  { %v414_v15 = vstv %s413_s24 }
  0xfc   :  { %496 = vrcp.f32 %v414_v15  ;;  %v367_v2 = vadd.f32 %v366_v17, %v365_v16 }
  0xfe   :  { %v368_v19 = vrot.slane %v367_v2, 2 }
 0x100   :  { %v369_v21 = vadd.f32 %v368_v19, %v367_v2 }
 0x102   :  { %v370_v22 = vrot.slane %v369_v21, 1 }
 0x104   :  { %v371_v24 = vadd.f32 %v370_v22, %v369_v21 }
 0x106   :  { %v497_v25 = vpop.eup %496  ;;  %471 = vpush %v371_v24 }
 0x107   :  { %473 = vpush %v410_v23 }
 0x108   :  { %475 = vpush %v497_v25 }
 0x137   :  { %s472_s26 = spop %471 }
 0x138   :  { %s474_s0 = spop %473 }
 0x139   :  { %s412_s1 = smul.f32 %s474_s0, %s436_s25  ;;  %s476_s27 = spop %475 }
 0x13b   :  { %s417_s2 = smul.f32 %s476_s27, %s412_s1 }
 0x13d   :  { %s418_s4 = sadd.f32 %s472_s26, %s417_s2 }
 0x13f   :  { %420 = sst [smem:[#allocation7]] %s418_s4 }
 0x140   :  { %531 = shalt.err (!%p528_p12)
}
 0x141   :  { %s542_s10 = smov [#allocation7]  }
 0x142   :  { %428 = dma.smem_to_hbm %s542_s10, 16, %s767_s5, [#allocation3]  }
 0x143   :  { %536 = dma.done.wait [#allocation3], 16  }
 0x144   :  { %537 = vsyncadd [#allocation3], 4294967280 }
 0x145   :  { %432 = sfence }
 0x146   :  { %433 = vsyncpa [#allocation3], 1 }
 0x147   :  { %434 = vsyncpa [#allocation4], 1 }
 0x148   :  { %435 = vsyncpa [#allocation6], 1 }

</bundles_post_ra>
